<compile_context>
chip_gen: v6e
topology: v6e:2x2x1
jax: 0.10.0
libtpu: 0.0.40
codegen_flags: <defaults>
</compile_context>

<pallas_src>
import numpy as np
import jax
import jax.numpy as jnp
from jax import lax
from jax.experimental import pallas as pl
from jax.experimental.pallas import tpu as pltpu

_LANE = 128
_SUBLANE = 8


def _round_up(x, m):
    return ((x + m - 1) // m) * m


# ----------------------------------------------------------------------------
# Host-side parameter prep (numpy, runs once at module-construction time):
# PyTorch-style bilinear interpolation + im2col-ordered pre-summed weight slab.
# ----------------------------------------------------------------------------
def _interp_matrix(in_size, out_size, scale_factor=None):
    """1-D bilinear interpolation matrix matching F.interpolate
    (mode='bilinear', align_corners=False)."""
    # TODO(synk): verify once against torch.nn.functional.interpolate directly
    # (scale_factor vs recompute_scale_factor source-index semantics).
    M = np.zeros((out_size, in_size), dtype=np.float64)
    for d in range(out_size):
        if scale_factor is not None and scale_factor > 0:
            scale = 1.0 / scale_factor          # scale_factor path
        else:
            scale = in_size / out_size          # explicit-size path
        src = (d + 0.5) * scale - 0.5
        src = max(src, 0.0)
        x0 = min(int(np.floor(src)), in_size - 1)
        x1 = min(x0 + 1, in_size - 1)
        lam = src - x0
        M[d, x0] += 1.0 - lam
        M[d, x1] += lam
    return M


def _bilinear_resize(w, out_hw, scale_factor=None):
    """Resize the trailing (KH, KW) dims of w (O, C, KH, KW)."""
    kh, kw = w.shape[2], w.shape[3]
    oh, ow = out_hw
    Mh = _interp_matrix(kh, oh, scale_factor)
    Mw = _interp_matrix(kw, ow, scale_factor)
    tmp = np.einsum("ij,ocjk->ocik", Mh, w)
    return np.einsum("kl,ocil->ocik", Mw, tmp)


def create_scaled_filters(weight, scales):
    """weight: (O, C, KH, KW) numpy. Returns (S, O, C, KH, KW)."""
    kh, kw = weight.shape[2], weight.shape[3]
    banks = []
    for s in scales:
        down_hw = (int(np.floor(kh * s)), int(np.floor(kw * s)))
        down = _bilinear_resize(weight, down_hw, scale_factor=s)
        up = _bilinear_resize(down, (kh, kw), scale_factor=None)
        banks.append(up)
    return np.stack(banks, axis=0).astype(np.float32)


def prepare_filter_slab(scaled_filters):
    """(S, O, C, KH, KW) -> (O, KH*KW*Cpad) im2col-ordered weight slab.

    Conv is linear in the weights, so sum_s conv(x, w_s) == conv(x, sum_s w_s):
    the S banks are pre-summed here.  The per-tap channel block is zero-padded
    from C to a multiple of 8 so the kernel's patch staging stores are full
    sublane-aligned vreg writes.  Host-side, runs once (not in the forward path).
    """
    _, O, C, KH, KW = scaled_filters.shape
    Cpad = _round_up(C, _SUBLANE)
    w_sum = np.asarray(scaled_filters, dtype=np.float32).sum(axis=0)   # (O,C,KH,KW)
    w_t = np.transpose(w_sum, (0, 2, 3, 1))                            # (O,KH,KW,C)
    slab = np.zeros((O, KH, KW, Cpad), dtype=np.float32)
    slab[..., :C] = w_t
    return slab.reshape(O, KH * KW * Cpad)


def _pick_images_per_step(N):
    """Largest divisor of N that keeps the grid length >= 2 (so both v7x
    TensorCores get work; harmless on single-TC v5e/v6e)."""
    if N <= 1:
        return 1
    best = 1
    for b in range(1, N // 2 + 1):
        if N % b == 0:
            best = b
    return best


# ----------------------------------------------------------------------------
# Pallas kernel: lane-dense im2col staging + one MXU matmul per grid step
# ----------------------------------------------------------------------------
def _make_conv_kernel(B, Cpad, KH, KW, Wp, Lp):
    """One grid step handles B images.

    x_ref:     (B, Cpad, Xp)   padded, flattened (lane-dense) NCHW images
    w_ref:     (O, K)          pre-summed, im2col-ordered, channel-padded slab
    o_ref:     (B, O, Lp)      lane-dense, 128-aligned 'wide' output rows
    patch_ref: (K, B*Lp)       VMEM scratch: im2col patch tile (K = KH*KW*Cpad)
    """
    def kernel(x_ref, w_ref, o_ref, patch_ref):
        # Stage the im2col tile: tap (kh, kw) -> an 8-sublane-aligned row block,
        # image b -> its own 128-aligned lane block.  Static slices only —
        # no in-kernel reshape/transpose, every store is a full vreg write.
        for b in range(B):
            col0 = b * Lp
            for kh in range(KH):
                for kw in range(KW):
                    start = kh * Wp + kw
                    row0 = (kh * KW + kw) * Cpad
                    patch_ref[row0:row0 + Cpad, col0:col0 + Lp] = (
                        x_ref[b, :, start:start + Lp])
        # Single MXU contraction for all B images of this step.
        res = jnp.dot(w_ref[...], patch_ref[...],
                      preferred_element_type=jnp.float32)
        # Lane-aligned (multiples of 128) slices back out per image.
        for b in range(B):
            o_ref[b] = res[:, b * Lp:(b + 1) * Lp].astype(o_ref.dtype)
        # TODO(synk): v5e variant if profiling shows the vst slot saturating at
        # large H*W: accumulate KH*KW small matmuls of lane-shifted x slices
        # into an f32 acc scratch instead of materializing the (K, B*Lp) tile.
    return kernel


def scale_equiv_conv2d(x_nchw, w_slab, kernel_size, padding=0,
                       images_per_step=None):
    """x_nchw: (N, C, H, W); w_slab: (O, KH*KW*Cpad) from prepare_filter_slab.
    Returns (N, O, OH, OW)."""
    N, C, H, W = x_nchw.shape
    KH = KW = kernel_size
    O, K = w_slab.shape
    Cpad = K // (KH * KW)
    assert Cpad >= C and Cpad % _SUBLANE == 0

    Hp, Wp = H + 2 * padding, W + 2 * padding
    OH, OW = Hp - KH + 1, Wp - KW + 1
    Lp = _round_up(OH * Wp, _LANE)          # lane-dense, 128-aligned wide rows
    # Lane extent of the flattened input: must cover the largest shifted slice
    # (KH-1)*Wp + (KW-1) + Lp (VMEM has no OOB check -> padding is mandatory).
    Xp = _round_up(max(Hp * Wp, (KH - 1) * Wp + (KW - 1) + Lp), _LANE)

    B = images_per_step if images_per_step is not None else _pick_images_per_step(N)
    assert N % B == 0

    # Channel pad to Cpad sublanes + spatial halo in one pass, flatten spatial
    # onto the lane axis, then pad the lane dim up to Xp (zeros).
    x_p = jnp.pad(x_nchw, ((0, 0), (0, Cpad - C),
                           (padding, padding), (padding, padding)))
    x_flat = x_p.reshape(N, Cpad, Hp * Wp)
    if Xp > Hp * Wp:
        x_flat = jnp.pad(x_flat, ((0, 0), (0, 0), (0, Xp - Hp * Wp)))

    cost = pl.CostEstimate(
        flops=2 * N * Lp * K * O,
        transcendentals=0,
        bytes_accessed=(N * Cpad * Xp + O * K + N * O * Lp) * 4)

    # TODO(synk): for realistic H*W (esp. v7x's 64 MiB VMEM) add an OH-row grid
    # axis with a KH-1 halo and size tiles against ~2*in + KH*KW*in + 2*out.
    out_wide = pl.pallas_call(
        _make_conv_kernel(B, Cpad, KH, KW, Wp, Lp),
        out_shape=jax.ShapeDtypeStruct((N, O, Lp), x_flat.dtype),
        grid_spec=pltpu.PrefetchScalarGridSpec(
            num_scalar_prefetch=0,
            grid=(N // B,),
            in_specs=[
                pl.BlockSpec((B, Cpad, Xp), lambda n: (n, 0, 0)),
                pl.BlockSpec((O, K), lambda n: (0, 0)),     # resident weights
            ],
            out_specs=pl.BlockSpec((B, O, Lp), lambda n: (n, 0, 0)),
            scratch_shapes=[pltpu.VMEM((K, B * Lp), jnp.float32)],
        ),
        compiler_params=pltpu.CompilerParams(
            dimension_semantics=("parallel",)),
        cost_estimate=cost,
    )(x_flat, w_slab)

    # Strip the wide-row junk (lane pad Lp -> OH*Wp, row stride Wp -> OW).
    # This is the single remaining post-kernel pass (the v2 jnp.pad pass is
    # gone); the reshape is free.
    return out_wide[:, :, :OH * Wp].reshape(N, O, OH, Wp)[:, :, :, :OW]


# ----------------------------------------------------------------------------
# Demo / correctness check
# ----------------------------------------------------------------------------
if __name__ == "__main__":
    in_channels, out_channels, kernel_size = 4, 8, 3
    scales = [1.0, 0.8, 0.6]
    padding = 0
    N, H, W = 2, 16, 16

    key = jax.random.PRNGKey(0)
    kx, kw_key = jax.random.split(key)

    # Deterministic "Conv2d" weight init (Kaiming-uniform-like bound).
    fan_in = in_channels * kernel_size * kernel_size
    bound = 1.0 / np.sqrt(fan_in)
    weight = jax.random.uniform(
        kw_key, (out_channels, in_channels, kernel_size, kernel_size),
        minval=-bound, maxval=bound, dtype=jnp.float32)

    scaled_filters = create_scaled_filters(np.asarray(weight), scales)  # (S,O,C,KH,KW)
    w_slab = jnp.asarray(prepare_filter_slab(scaled_filters))           # (O, K) once

    x = jax.random.normal(kx, (N, in_channels, H, W), dtype=jnp.float32)

    out = scale_equiv_conv2d(x, w_slab, kernel_size, padding=padding)
    out = jax.block_until_ready(out)

    # Reference: sum of per-scale convolutions (the module's forward).
    sf = jnp.asarray(scaled_filters)
    ref = sum(
        lax.conv_general_dilated(
            x, sf[s], window_strides=(1, 1),
            padding=[(padding, padding)] * 2,
            dimension_numbers=("NCHW", "OIHW", "NCHW"))
        for s in range(len(scales)))
    np.testing.assert_allclose(np.asarray(out), np.asarray(ref),
                               rtol=1e-4, atol=1e-4)

    print("KERNEL_OK")
</pallas_src>

<mosaic_0001>
module attributes {stable_mosaic.version = 11 : i64} {
  func.func @kernel(%arg0: i32, %arg1: memref<1x8x384xf32, #tpu.memory_space<vmem>>, %arg2: memref<8x72xf32, #tpu.memory_space<vmem>>, %arg3: memref<1x8x256xf32, #tpu.memory_space<vmem>>, %arg4: memref<72x256xf32, #tpu.memory_space<vmem>>) attributes {dimension_semantics = [#tpu.dimension_semantics<parallel>], iteration_bounds = array<i64: 2>, scalar_prefetch = 0 : i64, scratch_operands = 1 : i64, tpu.core_type = #tpu.core_type<tc>, window_params = [{transform_indices = @transform_0, window_bounds = array<i64: 1, 8, 384>}, {pipeline_mode = #tpu.pipeline_mode<synchronous>, transform_indices = @transform_1, window_bounds = array<i64: 8, 72>}, {transform_indices = @transform_2, window_bounds = array<i64: 1, 8, 256>}]} {
    %c0 = arith.constant 0 : index
    %c0_0 = arith.constant 0 : index
    %c0_1 = arith.constant 0 : index
    %0 = vector.load %arg1[%c0, %c0_0, %c0_1] : memref<1x8x384xf32, #tpu.memory_space<vmem>>, vector<1x8x256xf32>
    %1 = vector.shape_cast %0 : vector<1x8x256xf32> to vector<8x256xf32>
    %c0_2 = arith.constant 0 : index
    %c0_3 = arith.constant 0 : index
    %2 = vector.load %arg4[%c0_2, %c0_3] : memref<72x256xf32, #tpu.memory_space<vmem>>, vector<8x256xf32>
    tpu.vector_store %arg4[%c0_2, %c0_3], %1 {strides = array<i32>} : memref<72x256xf32, #tpu.memory_space<vmem>>, vector<8x256xf32>,
    %c0_4 = arith.constant 0 : index
    %c0_5 = arith.constant 0 : index
    %c1 = arith.constant 1 : index
    %3 = vector.load %arg1[%c0_4, %c0_5, %c1] : memref<1x8x384xf32, #tpu.memory_space<vmem>>, vector<1x8x256xf32>
    %4 = vector.shape_cast %3 : vector<1x8x256xf32> to vector<8x256xf32>
    %c8 = arith.constant 8 : index
    %c0_6 = arith.constant 0 : index
    %5 = vector.load %arg4[%c8, %c0_6] : memref<72x256xf32, #tpu.memory_space<vmem>>, vector<8x256xf32>
    tpu.vector_store %arg4[%c8, %c0_6], %4 {strides = array<i32>} : memref<72x256xf32, #tpu.memory_space<vmem>>, vector<8x256xf32>,
    %c0_7 = arith.constant 0 : index
    %c0_8 = arith.constant 0 : index
    %c2 = arith.constant 2 : index
    %6 = vector.load %arg1[%c0_7, %c0_8, %c2] : memref<1x8x384xf32, #tpu.memory_space<vmem>>, vector<1x8x256xf32>
    %7 = vector.shape_cast %6 : vector<1x8x256xf32> to vector<8x256xf32>
    %c16 = arith.constant 16 : index
    %c0_9 = arith.constant 0 : index
    %8 = vector.load %arg4[%c16, %c0_9] : memref<72x256xf32, #tpu.memory_space<vmem>>, vector<8x256xf32>
    tpu.vector_store %arg4[%c16, %c0_9], %7 {strides = array<i32>} : memref<72x256xf32, #tpu.memory_space<vmem>>, vector<8x256xf32>,
    %c0_10 = arith.constant 0 : index
    %c0_11 = arith.constant 0 : index
    %c16_12 = arith.constant 16 : index
    %9 = vector.load %arg1[%c0_10, %c0_11, %c16_12] : memref<1x8x384xf32, #tpu.memory_space<vmem>>, vector<1x8x256xf32>
    %10 = vector.shape_cast %9 : vector<1x8x256xf32> to vector<8x256xf32>
    %c24 = arith.constant 24 : index
    %c0_13 = arith.constant 0 : index
    %11 = vector.load %arg4[%c24, %c0_13] : memref<72x256xf32, #tpu.memory_space<vmem>>, vector<8x256xf32>
    tpu.vector_store %arg4[%c24, %c0_13], %10 {strides = array<i32>} : memref<72x256xf32, #tpu.memory_space<vmem>>, vector<8x256xf32>,
    %c0_14 = arith.constant 0 : index
    %c0_15 = arith.constant 0 : index
    %c17 = arith.constant 17 : index
    %12 = vector.load %arg1[%c0_14, %c0_15, %c17] : memref<1x8x384xf32, #tpu.memory_space<vmem>>, vector<1x8x256xf32>
    %13 = vector.shape_cast %12 : vector<1x8x256xf32> to vector<8x256xf32>
    %c32 = arith.constant 32 : index
    %c0_16 = arith.constant 0 : index
    %14 = vector.load %arg4[%c32, %c0_16] : memref<72x256xf32, #tpu.memory_space<vmem>>, vector<8x256xf32>
    tpu.vector_store %arg4[%c32, %c0_16], %13 {strides = array<i32>} : memref<72x256xf32, #tpu.memory_space<vmem>>, vector<8x256xf32>,
    %c0_17 = arith.constant 0 : index
    %c0_18 = arith.constant 0 : index
    %c18 = arith.constant 18 : index
    %15 = vector.load %arg1[%c0_17, %c0_18, %c18] : memref<1x8x384xf32, #tpu.memory_space<vmem>>, vector<1x8x256xf32>
    %16 = vector.shape_cast %15 : vector<1x8x256xf32> to vector<8x256xf32>
    %c40 = arith.constant 40 : index
    %c0_19 = arith.constant 0 : index
    %17 = vector.load %arg4[%c40, %c0_19] : memref<72x256xf32, #tpu.memory_space<vmem>>, vector<8x256xf32>
    tpu.vector_store %arg4[%c40, %c0_19], %16 {strides = array<i32>} : memref<72x256xf32, #tpu.memory_space<vmem>>, vector<8x256xf32>,
    %c0_20 = arith.constant 0 : index
    %c0_21 = arith.constant 0 : index
    %c32_22 = arith.constant 32 : index
    %18 = vector.load %arg1[%c0_20, %c0_21, %c32_22] : memref<1x8x384xf32, #tpu.memory_space<vmem>>, vector<1x8x256xf32>
    %19 = vector.shape_cast %18 : vector<1x8x256xf32> to vector<8x256xf32>
    %c48 = arith.constant 48 : index
    %c0_23 = arith.constant 0 : index
    %20 = vector.load %arg4[%c48, %c0_23] : memref<72x256xf32, #tpu.memory_space<vmem>>, vector<8x256xf32>
    tpu.vector_store %arg4[%c48, %c0_23], %19 {strides = array<i32>} : memref<72x256xf32, #tpu.memory_space<vmem>>, vector<8x256xf32>,
    %c0_24 = arith.constant 0 : index
    %c0_25 = arith.constant 0 : index
    %c33 = arith.constant 33 : index
    %21 = vector.load %arg1[%c0_24, %c0_25, %c33] : memref<1x8x384xf32, #tpu.memory_space<vmem>>, vector<1x8x256xf32>
    %22 = vector.shape_cast %21 : vector<1x8x256xf32> to vector<8x256xf32>
    %c56 = arith.constant 56 : index
    %c0_26 = arith.constant 0 : index
    %23 = vector.load %arg4[%c56, %c0_26] : memref<72x256xf32, #tpu.memory_space<vmem>>, vector<8x256xf32>
    tpu.vector_store %arg4[%c56, %c0_26], %22 {strides = array<i32>} : memref<72x256xf32, #tpu.memory_space<vmem>>, vector<8x256xf32>,
    %c0_27 = arith.constant 0 : index
    %c0_28 = arith.constant 0 : index
    %c34 = arith.constant 34 : index
    %24 = vector.load %arg1[%c0_27, %c0_28, %c34] : memref<1x8x384xf32, #tpu.memory_space<vmem>>, vector<1x8x256xf32>
    %25 = vector.shape_cast %24 : vector<1x8x256xf32> to vector<8x256xf32>
    %c64 = arith.constant 64 : index
    %c0_29 = arith.constant 0 : index
    %26 = vector.load %arg4[%c64, %c0_29] : memref<72x256xf32, #tpu.memory_space<vmem>>, vector<8x256xf32>
    tpu.vector_store %arg4[%c64, %c0_29], %25 {strides = array<i32>} : memref<72x256xf32, #tpu.memory_space<vmem>>, vector<8x256xf32>,
    %c0_30 = arith.constant 0 : index
    %c0_31 = arith.constant 0 : index
    %27 = vector.load %arg2[%c0_30, %c0_31] : memref<8x72xf32, #tpu.memory_space<vmem>>, vector<8x72xf32>
    %c0_32 = arith.constant 0 : index
    %c0_33 = arith.constant 0 : index
    %28 = vector.load %arg4[%c0_32, %c0_33] : memref<72x256xf32, #tpu.memory_space<vmem>>, vector<72x256xf32>
    %cst = arith.constant dense<0.000000e+00> : vector<8x256xf32>
    %29 = tpu.matmul %27, %28, %cst {dimension_numbers = #tpu.dot_dimension_numbers<[1], [0], [0], [1], [0, 0, 1, 1], [], []>} : vector<8x72xf32>, vector<72x256xf32>, vector<8x256xf32> -> vector<8x256xf32>
    %c0_34 = arith.constant 0 : index
    %c0_35 = arith.constant 0 : index
    %c0_36 = arith.constant 0 : index
    %30 = vector.load %arg3[%c0_34, %c0_35, %c0_36] : memref<1x8x256xf32, #tpu.memory_space<vmem>>, vector<1x8x256xf32>
    %31 = vector.shape_cast %30 : vector<1x8x256xf32> to vector<8x256xf32>
    %32 = vector.shape_cast %29 : vector<8x256xf32> to vector<1x8x256xf32>
    tpu.vector_store %arg3[%c0_34, %c0_35, %c0_36], %32 {strides = array<i32>} : memref<1x8x256xf32, #tpu.memory_space<vmem>>, vector<1x8x256xf32>,
    return
  }
  func.func @transform_0(%arg0: i32) -> (i32, i32, i32) {
    %c0_i32 = arith.constant 0 : i32
    %c0_i32_0 = arith.constant 0 : i32
    %c0_i32_1 = arith.constant 0 : i32
    return %arg0, %c0_i32, %c0_i32_0 : i32, i32, i32
  }
  func.func @transform_1(%arg0: i32) -> (i32, i32) {
    %c0_i32 = arith.constant 0 : i32
    %c0_i32_0 = arith.constant 0 : i32
    %c0_i32_1 = arith.constant 0 : i32
    return %c0_i32, %c0_i32_0 : i32, i32
  }
  func.func @transform_2(%arg0: i32) -> (i32, i32, i32) {
    %c0_i32 = arith.constant 0 : i32
    %c0_i32_0 = arith.constant 0 : i32
    %c0_i32_1 = arith.constant 0 : i32
    return %arg0, %c0_i32, %c0_i32_0 : i32, i32, i32
  }
}

</mosaic_0001>

<bundles_post_ra>
// kernel: tpu_custom_call.1
= control target key start
LH: loop header
LB: loop body
LE: loop exit
PB: predicated region body
PF: predicated region fallthrough
CT: control target
= control target key end

     0   :  { %7 = vsyncpa [#allocation4], 0  ;;  %s950_s0 = inlined_call_operand.hbm [shape: f32[2,8,384], index: 0, kind: input, shape index: {}]   ;;  %s951_s1 = inlined_call_operand.hbm [shape: f32[8,72], index: 1, kind: input, shape index: {}]   ;;  %s952_s2 = inlined_call_operand.hbm [shape: f32[2,8,256], index: 2, kind: output, shape index: {}]  }
   0x1   :  { %9 = vsyncpa [#allocation4 + $0x1], 0 }
   0x2   :  { %10 = vsyncpa [#allocation7], 0 }
   0x3   :  { %11 = vsyncpa [#allocation5], 0 }
   0x4   :  { %13 = vsyncpa [#allocation5 + $0x1], 0  ;;  %s755_s9 = smov 0   ;;  %s757_s10 = smov 0  }
   0x5   :  { %s759_s11 = smov 0   ;;  %s761_s12 = smov 0  }
   0x6 LB: > { %s776_s13 = sadd.s32 4294967295, %s726_s12   ;;  %s520_s14 = sadd.s32 4294967294, %s726_s12   ;;  %s726_s12 = sphi %s761_s12, %s975_s12   ;;  %s722_s11 = sphi %s759_s11, %s974_s11   ;;  %s718_s10 = sphi %s757_s10, %s973_s10   ;;  %s714_s9 = sphi %s755_s9, %s972_s9  }
   0x7   : > { %p39_p0 = scmp.ne.s32.totalorder %s718_s10, %s714_s9  ;;  %p953_p1 = scmp.eq.s32.totalorder %s776_s13, 0 }
   0x8   : > { %p90_p3 = scmp.eq.s32.totalorder %s520_s14, 1  ;;  %p521_p5 = scmp.ge.s32.totalorder %s726_s12, 1 }
   0x9   : > { %p785_p4 = por %p953_p1, %p39_p0  ;;  %p97_p7 = scmp.lt.s32.totalorder %s726_s12, 3 }
   0xa   : > { %p790_p6 = por %p90_p3, %p39_p0  ;;  %s728_s18 = smov [#allocation6]  }
   0xb   : > { %s957_s15 = scalar_select %p785_p4, 1, 0 }
   0xc   : > { %s958_s16 = scalar_select %p790_p6, 1, 0 }
   0xd   : > { %p795_p8 = pnand %p521_p5, %p97_p7  ;;  %s110_s19 = sshll.u32 %s728_s18, 4  ;;  %s111_s19 = int_to_ptr.vmem [resolvable:$true] %s110_s19 }
   0xe   : > { %s803_s20 = sadd.s32 1, %s726_s12   ;;  %s26_s24 = sadd.s32 1, %s722_s11 }
   0xf   : > { %s959_s17 = scalar_select %p795_p8, 1, 0 }
  0x10   : > { %p546_p10 = pneg %p795_p8  ;;  %s23_s22 = ssub.s32 %s726_s12, %s803_s20 }
  0x11   : > { %p813_p12 = scmp.eq.s32.totalorder %s23_s22, 0  ;;  %p33_p13 = scmp.ne.s32.totalorder %s722_s11, %s718_s10 }
  0x12   : > { %p807_p11 = pnand %p546_p10, %p953_p1  ;;  %s615_s25 = scalar_lea.vmem %s111_s19, 128 }
  0x13   : > { %p616_p3 = scmp.ne.s32.totalorder %s111_s19, %s615_s25  ;;  %p623_p9 = scmp.lt.s32.totalorder %s111_s19, %s111_s19 }
  0x14   : > { %p606_p0 = pneg %p807_p11  ;;  %p624_p2 = scmp.lt.s32.totalorder %s615_s25, %s615_s25 }
  0x16   : > { %p618_p5 = pnand %p616_p3, %p606_p0  ;;  %p625_p10 = por %p624_p2, %p623_p9 }
  0x18   : > { %p619_p7 = pneg %p618_p5 }
  0x1a   : > { %p626_p1 = pnand %p625_p10, %p619_p7 }
  0x1c   : > { %629 = shalt.err (!%p626_p1)
}
  0x1d   : > { %549 = dma.hbm_to_vmem [thread:$0]  (!%p807_p11), %s951_s1, 128, %s111_s19, [#allocation7]  }
  0x1e   : > { %s830_s28 = scalar_select %p813_p12, %s722_s11, %s26_s24  }
  0x1f   : > { %p34_p1 = scmp.eq.s32.totalorder %s726_s12, 0  ;;  %p962_p2 = scmp.eq.s32.totalorder %s776_s13, 1 }
  0x20   : > { %p559_p0 = scmp.lt.s32.totalorder %s726_s12, 2  ;;  %s121_s30 = sand.u32 1, %s722_s11  }
  0x21   : > { %p838_p9 = por %p962_p2, %p33_p13  ;;  %p35_p3 = por %p34_p1, %p33_p13 }
  0x22   : > { %s535_s3 = smul.u32 24, %s121_s30  ;;  %s122_s19 = scalar_lea.sflag [#allocation4], %s121_s30 }
  0x23   : > { %s963_s29 = scalar_select %p838_p9, 1, 0 }
  0x24   : > { %s536_s4 = smul.u32 384, %s726_s12  ;;  %p848_p5 = pnand %p559_p0, %p35_p3 }
  0x25   : > { %s125_s14 = scalar_lea.vmem [#allocation3], %s535_s3  ;;  %s635_s24 = scalar_lea.hbm %s950_s0, 768 }
  0x26   : > { %s855_s8 = scalar_lea.hbm %s950_s0, %s536_s4  ;;  %s133_s18 = sshll.u32 %s125_s14, 4  ;;  %s134_s18 = int_to_ptr.vmem [resolvable:$true] %s133_s18 }
  0x27   : > { %s630_s21 = scalar_lea.hbm %s855_s8, 384  ;;  %p632_p12 = pneg %p848_p5 }
  0x28   : > { %p631_p11 = scmp.ne.s32.totalorder %s855_s8, %s630_s21  ;;  %p636_p10 = scmp.lt.s32.totalorder %s855_s8, %s950_s0 }
  0x29   : > { %p637_p1 = scmp.lt.s32.totalorder %s635_s24, %s630_s21 }
  0x2a   : > { %p633_p13 = pnand %p632_p12, %p631_p11 }
  0x2b   : > { %p638_p2 = por %p637_p1, %p636_p10 }
  0x2c   : > { %p634_p7 = pneg %p633_p13 }
  0x2e   : > { %p639_p0 = pnand %p638_p2, %p634_p7 }
  0x30   : > { %642 = shalt.err (!%p639_p0)
}
  0x31   : > { %s643_s27 = scalar_lea.vmem %s134_s18, 384  ;;  %s729_s30 = smov [#allocation3]  }
  0x32   : > { %p644_p3 = scmp.ne.s32.totalorder %s134_s18, %s643_s27  ;;  %s648_s3 = sshll.u32 %s729_s30, 4  ;;  %s649_s3 = int_to_ptr.vmem [resolvable:$false] %s648_s3 }
  0x33   : > { %s650_s4 = scalar_lea.vmem %s649_s3, 768  ;;  %p651_p11 = scmp.lt.s32.totalorder %s134_s18, %s649_s3 }
  0x34   : > { %p646_p6 = pnand %p644_p3, %p632_p12  ;;  %p652_p13 = scmp.lt.s32.totalorder %s650_s4, %s643_s27 }
  0x36   : > { %p647_p9 = pneg %p646_p6  ;;  %p653_p4 = por %p652_p13, %p651_p11 }
  0x38   : > { %p654_p8 = pnand %p653_p4, %p647_p9 }
  0x3a   : > { %657 = shalt.err (!%p654_p8)
}
  0x3b   : > { %553 = dma.hbm_to_vmem [thread:$0]  (!%p848_p5), %s855_s8, 384, %s134_s18, %s122_s19  }
  0x3c   : > { %p965_p7 = scmp.ne.s32.totalorder %s959_s17, 0 }
  0x3d   : > { %s874_s6 = sand.u32 (!%p965_p7), 1, %s718_s10   ;;  %p966_p6 = scmp.ne.s32.totalorder (!%p965_p7), %s957_s15, 0 }
  0x3e   : > { %142 = sbr.rel (%p965_p7) target bundleno = 444 (0x1bc), region = 28  ;;  %s145_s14 = scalar_lea.sflag (!%p965_p7), [#allocation4], %s874_s6 }
  0x3f   : > { %s537_s7 = smul.u32 (!%p965_p7), 24, %s874_s6 }
  0x41   : > { %s148_s21 = scalar_lea.vmem (!%p965_p7), [#allocation3], %s537_s7 }
  0x43   : > { %701 = dma.done.wait (%p966_p6), %s145_s14, 384  }
  0x44   : > { %703 = vsyncadd (%p966_p6), %s145_s14, 4294966912  ;;  %p967_p4 = scmp.eq.s32.totalorder %s776_s13, 0 }
  0x46   : > { %705 = dma.done.wait (%p967_p4), [#allocation7], 128   ;;  %p968_p8 = pmov %p967_p4 }
  0x47   : > { %v886_v0 = vld [vmem:[%s148_s21 + $0x8] sm:$0xff]  ;;  %v888_v1 = vld [vmem:[%s148_s21] sm:$0xff]  ;;  %s730_s17 = smov 94   ;;  %v312_v2 = vld [vmem:[%s148_s21 + $0x10] sm:$0xff]  ;;  %s731_s5 = smov 95   ;;  %v736_v3 = vmov 0.0  }
  0x48   : > { %707 = vsyncadd (%p968_p8), [#allocation7], 4294967168  ;;  %318 = vrot.lane.b32.xlu0 %v886_v0, %s730_s17  ;;  %316 = vrot.lane.b32.xlu1 %v888_v1, %s730_s17  ;;  %s732_s15 = smov 96   ;;  %s733_s8 = smov 110   ;;  %vm322_vm0 = vcmask 769024   ;;  %vm303_vm1 = vcmask 777216  }
  0x49   : > { %s734_s18 = smov 111   ;;  %s735_s19 = smov 112   ;;  %416 = vmatprep.mubr.f32.mxu0 %v736_v3  ;;  %vm284_vm2 = vcmask 785408   ;;  %vm265_vm3 = vcmask 900096   ;;  %vm246_vm4 = vcmask 908288   ;;  %vm227_vm5 = vcmask 916480  }
  0x4a   : > { %s737_s22 = smov 126   ;;  %s738_s23 = smov 127   ;;  %vm208_vm6 = vcmask 1031168   ;;  %vm189_vm7 = vcmask 1039360   ;;  %v329_v44 = vld [vmem:[#allocation6] sm:$0xff]  ;;  %vm348_vm8 = vcmask 588800  }
  0x4b   : > { %s527_s24 = sshll.u32 %s874_s6, 4  ;;  %s534_s27 = sshll.u32 %s776_s13, 8 }
  0x4c   : > { %320 = vrot.lane.b32.xlu0 %v312_v2, %s730_s17  ;;  %299 = vrot.lane.b32.xlu1 %v886_v0, %s731_s5  ;;  %s172_s25 = scalar_lea.vmem [#allocation8], %s527_s24  ;;  %s438_s4 = scalar_lea.hbm %s952_s2, %s534_s27 }
  0x4d   : > { %s440_s26 = sshll.u32 %s172_s25, 4  ;;  %s426_s7 = scalar_lea.sflag [#allocation5], %s874_s6  ;;  %s910_s26 = int_to_ptr.vmem [resolvable:$true] %s440_s26 }
  0x4e   : > { %s658_s14 = scalar_lea.vmem %s910_s26, 256  ;;  %p969_p5 = scmp.ne.s32.totalorder %s963_s29, 0 }
  0x4f   : > { %p659_p9 = scmp.ne.s32.totalorder %s910_s26, %s658_s14  ;;  %s739_s13 = smov [#allocation8]  }
  0x50   : > { %301 = vrot.lane.b32.xlu0 %v312_v2, %s731_s5  ;;  %297 = vrot.lane.b32.xlu1 %v888_v1, %s731_s5  ;;  %s662_s21 = sshll.u32 %s739_s13, 4  ;;  %s663_s21 = int_to_ptr.vmem [resolvable:$false] %s662_s21 }
  0x51   : > { %p660_p12 = pnand %p659_p9, %p969_p5  ;;  %s664_s17 = scalar_lea.vmem %s663_s21, 512 }
  0x52   : > { %p665_p1 = scmp.lt.s32.totalorder %s910_s26, %s663_s21  ;;  %p666_p2 = scmp.lt.s32.totalorder %s664_s17, %s658_s14 }
  0x53   : > { %p661_p10 = pneg %p660_p12 }
  0x54   : > { %282 = vrot.lane.b32.xlu1 %v312_v2, %s732_s15  ;;  %280 = vrot.lane.b32.xlu0 %v886_v0, %s732_s15  ;;  %p667_p0 = por %p666_p2, %p665_p1 }
  0x56   : > { %p668_p3 = pnand %p667_p0, %p661_p10 }
  0x58   : > { %278 = vrot.lane.b32.xlu0 %v888_v1, %s732_s15  ;;  %261 = vrot.lane.b32.xlu1 %v886_v0, %s733_s8 }
  0x5c   : > { %263 = vrot.lane.b32.xlu0 %v312_v2, %s733_s8  ;;  %259 = vrot.lane.b32.xlu1 %v888_v1, %s733_s8 }
  0x60   : > { %244 = vrot.lane.b32.xlu1 %v312_v2, %s734_s18  ;;  %242 = vrot.lane.b32.xlu0 %v886_v0, %s734_s18 }
  0x64   : > { %240 = vrot.lane.b32.xlu0 %v888_v1, %s734_s18  ;;  %223 = vrot.lane.b32.xlu1 %v886_v0, %s735_s19 }
  0x68   : > { %225 = vrot.lane.b32.xlu0 %v312_v2, %s735_s19  ;;  %221 = vrot.lane.b32.xlu1 %v888_v1, %s735_s19 }
  0x6c   : > { %206 = vrot.lane.b32.xlu1 %v312_v2, %s737_s22  ;;  %204 = vrot.lane.b32.xlu0 %v886_v0, %s737_s22 }
  0x70   : > { %202 = vrot.lane.b32.xlu0 %v888_v1, %s737_s22  ;;  %185 = vrot.lane.b32.xlu1 %v886_v0, %s738_s23 }
  0x74   : > { %187 = vrot.lane.b32.xlu0 %v312_v2, %s738_s23  ;;  %183 = vrot.lane.b32.xlu1 %v888_v1, %s738_s23 }
  0xba   : > { %v319_v4 = vpop.permute.xlu0 %318  ;;  %v317_v5 = vpop.permute.xlu1 %316 }
  0xbb   : > { %v323_v9 = vsel %vm322_vm0, %v317_v5, %v319_v4 }
  0xbe   : > { %v321_v6 = vpop.permute.xlu0 %320  ;;  %v300_v7 = vpop.permute.xlu1 %299 }
  0xbf   : > { %v324_v8 = vsel %vm322_vm0, %v319_v4, %v321_v6 }
  0xc0   : > { %366 = vmatprep.subr.mxu0 %v324_v8 }
  0xc1   : > { %367 = vmatpush1.msra.mxu0 %v323_v9 }
  0xc2   : > { %v302_v10 = vpop.permute.xlu0 %301  ;;  %v298_v11 = vpop.permute.xlu1 %297 }
  0xc3   : > { %v305_v12 = vsel %vm303_vm1, %v300_v7, %v302_v10  ;;  %v304_v13 = vsel %vm303_vm1, %v298_v11, %v300_v7 }
  0xc4   : > { %368 = vmatprep.subr.mxu0 %v305_v12 }
  0xc5   : > { %369 = vmatpush1.msra.mxu0 %v304_v13 }
  0xc6   : > { %v283_v14 = vpop.permute.xlu1 %282  ;;  %v281_v15 = vpop.permute.xlu0 %280 }
  0xc7   : > { %v286_v16 = vsel %vm284_vm2, %v281_v15, %v283_v14 }
  0xc8   : > { %370 = vmatprep.subr.mxu0 %v286_v16 }
  0xca   : > { %v279_v17 = vpop.permute.xlu0 %278  ;;  %v262_v18 = vpop.permute.xlu1 %261 }
  0xcb   : > { %v285_v19 = vsel %vm284_vm2, %v279_v17, %v281_v15 }
  0xcc   : > { %371 = vmatpush1.msra.mxu0 %v285_v19 }
  0xce   : > { %v264_v20 = vpop.permute.xlu0 %263  ;;  %v260_v21 = vpop.permute.xlu1 %259 }
  0xcf   : > { %v267_v22 = vsel %vm265_vm3, %v262_v18, %v264_v20  ;;  %v266_v23 = vsel %vm265_vm3, %v260_v21, %v262_v18 }
  0xd0   : > { %372 = vmatprep.subr.mxu0 %v267_v22 }
  0xd1   : > { %373 = vmatpush1.msra.mxu0 %v266_v23 }
  0xd2   : > { %v245_v24 = vpop.permute.xlu1 %244  ;;  %v243_v25 = vpop.permute.xlu0 %242 }
  0xd3   : > { %v248_v26 = vsel %vm246_vm4, %v243_v25, %v245_v24 }
  0xd4   : > { %374 = vmatprep.subr.mxu0 %v248_v26 }
  0xd6   : > { %v241_v27 = vpop.permute.xlu0 %240  ;;  %v224_v28 = vpop.permute.xlu1 %223 }
  0xd7   : > { %v247_v29 = vsel %vm246_vm4, %v241_v27, %v243_v25 }
  0xd8   : > { %375 = vmatpush1.msra.mxu0 %v247_v29 }
  0xda   : > { %v226_v30 = vpop.permute.xlu0 %225  ;;  %v222_v31 = vpop.permute.xlu1 %221 }
  0xdb   : > { %v229_v32 = vsel %vm227_vm5, %v224_v28, %v226_v30  ;;  %v228_v33 = vsel %vm227_vm5, %v222_v31, %v224_v28 }
  0xdc   : > { %376 = vmatprep.subr.mxu0 %v229_v32 }
  0xdd   : > { %377 = vmatpush1.msra.mxu0 %v228_v33 }
  0xde   : > { %v207_v34 = vpop.permute.xlu1 %206  ;;  %v205_v35 = vpop.permute.xlu0 %204 }
  0xdf   : > { %v210_v36 = vsel %vm208_vm6, %v205_v35, %v207_v34 }
  0xe0   : > { %378 = vmatprep.subr.mxu0 %v210_v36 }
  0xe2   : > { %v203_v37 = vpop.permute.xlu0 %202  ;;  %v186_v38 = vpop.permute.xlu1 %185 }
  0xe3   : > { %v209_v39 = vsel %vm208_vm6, %v203_v37, %v205_v35 }
  0xe4   : > { %379 = vmatpush1.msra.mxu0 %v209_v39 }
  0xe6   : > { %v188_v40 = vpop.permute.xlu0 %187  ;;  %v184_v41 = vpop.permute.xlu1 %183 }
  0xe7   : > { %v191_v42 = vsel %vm189_vm7, %v186_v38, %v188_v40  ;;  %v190_v43 = vsel %vm189_vm7, %v184_v41, %v186_v38 }
  0xe8   : > { %380 = vmatprep.subr.mxu0 %v191_v42 }
  0xe9   : > { %381 = vmatpush1.msra.mxu0 %v190_v43 }
  0xea   : > { %382 = vmatprep.subr.mxu0 %v886_v0 }
  0xeb   : > { %383 = vmatpush1.msra.mxu0 %v888_v1 }
  0xec   : > { %528 = vmatmul.mubr.msk.f32.vlgmr.msra.gmra.mxu0 %vm348_vm8, %v329_v44 }
 0x1ac   : > { %v418_v45 = vpop.f32.mrf.mxu0 }
 0x1ad   : > { %423 = vst [vmem:[%s172_s25] sm:$0xff] %v418_v45 }
 0x1ae   : > { %v420_v46 = vpop.f32.mrf.mxu0 }
 0x1af   : > { %424 = vst [vmem:[%s172_s25 + $0x8] sm:$0xff] %v420_v46 }
 0x1b0   : > { %671 = shalt.err (!%p668_p3)
}
 0x1b1   : > { %s672_s5 = scalar_lea.hbm %s438_s4, 256  ;;  %s676_s8 = scalar_lea.hbm %s952_s2, 512 }
 0x1b2   : > { %p673_p11 = scmp.ne.s32.totalorder %s438_s4, %s672_s5  ;;  %p677_p6 = scmp.lt.s32.totalorder %s438_s4, %s952_s2 }
 0x1b3   : > { %p678_p4 = scmp.lt.s32.totalorder %s676_s8, %s672_s5 }
 0x1b4   : > { %p674_p13 = pnand %p673_p11, %p969_p5 }
 0x1b5   : > { %p679_p8 = por %p678_p4, %p677_p6 }
 0x1b6   : > { %p675_p7 = pneg %p674_p13 }
 0x1b8   : > { %p680_p9 = pnand %p679_p8, %p675_p7 }
 0x1ba   : > { %683 = shalt.err (!%p680_p9)
}
 0x1bb   : > { %544 = dma.vmem_to_hbm [thread:$0]  (%p969_p5), %s910_s26, 256, %s438_s4, %s426_s7  }
 0x1bc PF: > { %s452_s22 = sand.u32 1, %s714_s9   ;;  %p970_p12 = scmp.ne.s32.totalorder %s958_s16, 0 }
 0x1bd   : > { %p971_p10 = scmp.ge.s32.totalorder %s726_s12, 2  ;;  %s453_s23 = scalar_lea.sflag [#allocation5], %s452_s22 }
 0x1bf   : > { %p555_p1 = pnand %p971_p10, %p970_p12 }
 0x1c1   : > { %p556_p2 = pneg %p555_p1 }
 0x1c3   : > { %709 = dma.done.wait (%p556_p2), %s453_s23, 256  }
 0x1c4   : > { %711 = vsyncadd (%p556_p2), %s453_s23, 4294967040  ;;  %p16_p0 = scmp.ge.s32.totalorder %s803_s20, 4   ;;  %s972_s9 = smov %s718_s10 }
 0x1c5   : > { %s973_s10 = smov %s722_s11  ;;  %s974_s11 = smov %s830_s28 }
 0x1c6   : > { %s975_s12 = smov %s803_s20  ;;  %18 = sbr.rel (!%p16_p0) target bundleno = 6 (0x6), region = 77 }
 0x1cb   :  { %458 = vsyncpa [#allocation4], 1 }
 0x1cc   :  { %460 = vsyncpa [#allocation4 + $0x1], 1 }
 0x1cd   :  { %461 = vsyncpa [#allocation7], 1 }
 0x1ce   :  { %462 = vsyncpa [#allocation5], 1 }
 0x1cf   :  { %464 = vsyncpa [#allocation5 + $0x1], 1 }

</bundles_post_ra>
